<compile_context>
chip_gen: v7x
topology: tpu7x:2x2x1
jax: 0.10.0
libtpu: 0.0.40
codegen_flags: <defaults>
</compile_context>

<pallas_src>
import jax
import jax.numpy as jnp
from jax import lax
from jax.experimental import pallas as pl
from jax.experimental.pallas import tpu as pltpu


# --------------------------------------------------------------------------- #
# Kernel 1: node projection  h = x @ W   (x already out-degree-normalised)
# --------------------------------------------------------------------------- #
def _gcn_project_kernel(x_ref, w_ref, h_ref):
    h_ref[...] = jnp.dot(x_ref[...], w_ref[...],
                         preferred_element_type=jnp.float32)


# --------------------------------------------------------------------------- #
# Kernel 2: per-dst-row-tile edge scores + edge_softmax + neighbor aggregation
# --------------------------------------------------------------------------- #
def _gcn_edge_kernel(adj_ref, h_full_ref, h_dst_ref, norm_in_ref, bias_ref,
                     rst_ref, esoft_ref):
    A = adj_ref[...].astype(jnp.float32)       # (TM, N) bf16 0/1 -> f32
    h = h_full_ref[...]                        # (N, Fout), resident across grid
    h_dst = h_dst_ref[...]                     # (TM, Fout), this dst tile

    # e[dst, src] = sum_f tanh(h[dst, f]) * h[src, f]   (no explicit h^T)
    e = lax.dot_general(jnp.tanh(h_dst), h,
                        (((1,), (1,)), ((), ())),
                        preferred_element_type=jnp.float32)   # (TM, N)
    e = jnp.where(e > 0, e, 0.2 * e)           # LeakyReLU(0.2)

    # edge_softmax over incoming edges of each dst row.
    mask = A > 0.0
    e_m = jnp.where(mask, e, jnp.float32(-1e30))
    m = jnp.max(e_m, axis=1, keepdims=True)
    p = jnp.where(mask, jnp.exp(e_m - m), 0.0)
    s = jnp.sum(p, axis=1, keepdims=True)
    inv_s = 1.0 / jnp.where(s > 0, s, 1.0)     # exact divide, (TM,1) only
    esoft_ref[...] = p * inv_s

    # message passing (copy_u + sum): rst[dst] = sum_{src in N(dst)} h[src]
    rst = jnp.dot(A, h, preferred_element_type=jnp.float32)   # (TM, Fout)
    rst_ref[...] = rst * norm_in_ref[...] + bias_ref[...]


# --------------------------------------------------------------------------- #
# Wrapper
# --------------------------------------------------------------------------- #
def _pick_tile(n, preferred=128):
    for t in (preferred, 256, 128, 64, 32, 16, 8):
        if t <= n and n % t == 0:
            return t
    return n


def graph_conv(adj, feat, weight, bias, *, norm="both", tile_m=128):
    N = adj.shape[0]
    Fin, Fout = weight.shape
    TM = _pick_tile(N, tile_m)
    grid = (N // TM,)

    # Degree norms hoisted out of the kernel: the full column/row reductions of
    # A cannot be computed inside a single dst-row tile.
    if norm == "both":
        norm_out = lax.rsqrt(jnp.maximum(jnp.sum(adj, axis=0), 1.0)).reshape(N, 1)
        norm_in = lax.rsqrt(jnp.maximum(jnp.sum(adj, axis=1), 1.0)).reshape(N, 1)
    elif norm == "right":
        norm_out = jnp.ones((N, 1), jnp.float32)
        norm_in = (1.0 / jnp.maximum(jnp.sum(adj, axis=1), 1.0)).reshape(N, 1)
    else:  # 'none'
        norm_out = jnp.ones((N, 1), jnp.float32)
        norm_in = jnp.ones((N, 1), jnp.float32)

    # Apply the out-degree norm to feat BEFORE the matmul (same op order as the
    # reference / PyTorch module) so MXU operand rounding matches exactly.
    x = (feat * norm_out).astype(jnp.float32)

    adj_bf16 = adj.astype(jnp.bfloat16)        # 0/1 exact; halves N^2 HBM read
    bias2d = bias.reshape(1, Fout).astype(jnp.float32)

    cparams = pltpu.CompilerParams(
        dimension_semantics=("parallel",),
        vmem_limit_bytes=64 * 1024 * 1024,
    )

    # Kernel 1: h = x @ W, tiled over node rows.
    h = pl.pallas_call(
        _gcn_project_kernel,
        out_shape=jax.ShapeDtypeStruct((N, Fout), jnp.float32),
        grid=grid,
        in_specs=[
            pl.BlockSpec((TM, Fin), lambda i: (i, 0)),
            pl.BlockSpec((Fin, Fout), lambda i: (0, 0)),
        ],
        out_specs=pl.BlockSpec((TM, Fout), lambda i: (i, 0)),
        compiler_params=cparams,
    )(x, weight)

    # Kernel 2: edge scores + softmax + aggregation, tiled over dst rows.
    rst, e_soft = pl.pallas_call(
        _gcn_edge_kernel,
        out_shape=(jax.ShapeDtypeStruct((N, Fout), jnp.float32),
                   jax.ShapeDtypeStruct((N, N), jnp.float32)),
        grid=grid,
        in_specs=[
            pl.BlockSpec((TM, N), lambda i: (i, 0)),      # adjacency dst-row tile (bf16)
            pl.BlockSpec((N, Fout), lambda i: (0, 0)),    # h of all src nodes (resident)
            pl.BlockSpec((TM, Fout), lambda i: (i, 0)),   # h of this dst tile
            pl.BlockSpec((TM, 1), lambda i: (i, 0)),      # in-degree norm column
            pl.BlockSpec((1, Fout), lambda i: (0, 0)),    # bias
        ],
        out_specs=(pl.BlockSpec((TM, Fout), lambda i: (i, 0)),
                   pl.BlockSpec((TM, N), lambda i: (i, 0))),
        compiler_params=cparams,
    )(adj_bf16, h, h, norm_in, bias2d)

    return rst, e_soft


# --------------------------------------------------------------------------- #
# Pure-JAX reference for correctness checking (mirrors the PyTorch forward).
# --------------------------------------------------------------------------- #
def graph_conv_ref(adj, feat, weight, bias):
    deg_out = jnp.maximum(adj.sum(axis=0), 1.0)
    x = feat * (deg_out ** -0.5)[:, None]
    h = x @ weight
    e = jnp.tanh(h) @ h.T                       # e[dst, src]
    e = jnp.where(e > 0, e, 0.2 * e)
    mask = adj > 0
    e_m = jnp.where(mask, e, -1e30)
    p = jnp.where(mask, jnp.exp(e_m - e_m.max(axis=1, keepdims=True)), 0.0)
    s = p.sum(axis=1, keepdims=True)
    e_soft = p / jnp.where(s > 0, s, 1.0)
    rst = adj @ h
    deg_in = jnp.maximum(adj.sum(axis=1), 1.0)
    rst = rst * (deg_in ** -0.5)[:, None] + bias[None, :]
    return rst, e_soft


if __name__ == "__main__":
    # in_feats > out_feats -> matmul-before-aggregation branch of the forward.
    N, Fin, Fout = 256, 64, 32

    key = jax.random.PRNGKey(0)
    k_adj, k_feat, k_w = jax.random.split(key, 3)

    # Random graph with self-loops (avoids zero in/out degree, per module docs).
    adj = (jax.random.uniform(k_adj, (N, N)) < 0.1).astype(jnp.float32)
    adj = jnp.maximum(adj, jnp.eye(N, dtype=jnp.float32))

    feat = jax.random.normal(k_feat, (N, Fin), dtype=jnp.float32)

    # Xavier (Glorot) uniform init for weight, zeros for bias.
    bound = (6.0 / (Fin + Fout)) ** 0.5
    weight = jax.random.uniform(k_w, (Fin, Fout), dtype=jnp.float32,
                                minval=-bound, maxval=bound)
    bias = jnp.zeros((Fout,), dtype=jnp.float32)

    rst, e_soft = graph_conv(adj, feat, weight, bias, norm="both")
    jax.block_until_ready((rst, e_soft))

    rst_ref, e_soft_ref = graph_conv_ref(adj, feat, weight, bias)
    assert jnp.allclose(rst, rst_ref, atol=1e-4, rtol=1e-4), "rst mismatch"
    assert jnp.allclose(e_soft, e_soft_ref, atol=1e-3, rtol=1e-3), "e_soft mismatch"

    print("KERNEL_OK")
</pallas_src>

<mosaic_0001>
module attributes {stable_mosaic.version = 11 : i64} {
  func.func @_gcn_project_kernel(%arg0: i32, %arg1: memref<128x64xf32, #tpu.memory_space<vmem>>, %arg2: memref<64x32xf32, #tpu.memory_space<vmem>>, %arg3: memref<128x32xf32, #tpu.memory_space<vmem>>) attributes {dimension_semantics = [#tpu.dimension_semantics<parallel>], iteration_bounds = array<i64: 2>, scalar_prefetch = 0 : i64, scratch_operands = 0 : i64, tpu.core_type = #tpu.core_type<tc>, window_params = [{transform_indices = @transform_0, window_bounds = array<i64: 128, 64>}, {pipeline_mode = #tpu.pipeline_mode<synchronous>, transform_indices = @transform_1, window_bounds = array<i64: 64, 32>}, {transform_indices = @transform_2, window_bounds = array<i64: 128, 32>}]} {
    %c0 = arith.constant 0 : index
    %c0_0 = arith.constant 0 : index
    %0 = vector.load %arg1[%c0, %c0_0] : memref<128x64xf32, #tpu.memory_space<vmem>>, vector<128x64xf32>
    %c0_1 = arith.constant 0 : index
    %c0_2 = arith.constant 0 : index
    %1 = vector.load %arg2[%c0_1, %c0_2] : memref<64x32xf32, #tpu.memory_space<vmem>>, vector<64x32xf32>
    %cst = arith.constant dense<0.000000e+00> : vector<128x32xf32>
    %2 = tpu.matmul %0, %1, %cst {dimension_numbers = #tpu.dot_dimension_numbers<[1], [0], [0], [1], [0, 0, 1, 1], [], []>} : vector<128x64xf32>, vector<64x32xf32>, vector<128x32xf32> -> vector<128x32xf32>
    %c0_3 = arith.constant 0 : index
    %c0_4 = arith.constant 0 : index
    %3 = vector.load %arg3[%c0_3, %c0_4] : memref<128x32xf32, #tpu.memory_space<vmem>>, vector<128x32xf32>
    tpu.vector_store %arg3[%c0_3, %c0_4], %2 {strides = array<i32>} : memref<128x32xf32, #tpu.memory_space<vmem>>, vector<128x32xf32>,
    return
  }
  func.func @transform_0(%arg0: i32) -> (i32, i32) {
    %c0_i32 = arith.constant 0 : i32
    %c0_i32_0 = arith.constant 0 : i32
    return %arg0, %c0_i32 : i32, i32
  }
  func.func @transform_1(%arg0: i32) -> (i32, i32) {
    %c0_i32 = arith.constant 0 : i32
    %c0_i32_0 = arith.constant 0 : i32
    %c0_i32_1 = arith.constant 0 : i32
    return %c0_i32, %c0_i32_0 : i32, i32
  }
  func.func @transform_2(%arg0: i32) -> (i32, i32) {
    %c0_i32 = arith.constant 0 : i32
    %c0_i32_0 = arith.constant 0 : i32
    return %arg0, %c0_i32 : i32, i32
  }
}

</mosaic_0001>

<bundles_post_ra>
// kernel: tpu_custom_call.1
= control target key start
LH: loop header
LB: loop body
LE: loop exit
PB: predicated region body
PF: predicated region fallthrough
CT: control target
= control target key end

     0   :  { %7 = vsyncpa [#allocation3], 0  ;;  %s1126_s0 = inlined_call_operand.hbm [shape: f32[256,64], index: 0, kind: input, shape index: {}]   ;;  %s1127_s1 = inlined_call_operand.hbm [shape: f32[64,32], index: 1, kind: input, shape index: {}]   ;;  %s1128_s2 = inlined_call_operand.hbm [shape: f32[256,32], index: 2, kind: output, shape index: {}]  }
   0x1   :  { %9 = vsyncpa [#allocation3 + $0x1], 0 }
   0x2   :  { %10 = vsyncpa [#allocation6], 0 }
   0x3   :  { %11 = vsyncpa [#allocation4], 0 }
   0x4   :  { %13 = vsyncpa [#allocation4 + $0x1], 0  ;;  %s846_s9 = smov 0   ;;  %s848_s10 = smov 0  }
   0x5   :  { %s850_s11 = smov 0   ;;  %s852_s12 = smov 0  }
   0x6 LB: > { %s867_s13 = sadd.s32 4294967295, %s822_s12   ;;  %s511_s14 = sadd.s32 4294967294, %s822_s12   ;;  %s822_s12 = sphi %s852_s12, %s1148_s12   ;;  %s818_s11 = sphi %s850_s11, %s1147_s11   ;;  %s814_s10 = sphi %s848_s10, %s1146_s10   ;;  %s810_s9 = sphi %s846_s9, %s1145_s9  }
   0x7   : > { %p39_p0 = scmp.ne.s32.totalorder %s814_s10, %s810_s9  ;;  %p1129_p1 = scmp.eq.s32.totalorder %s867_s13, 0 }
   0x8   : > { %p90_p3 = scmp.eq.s32.totalorder %s511_s14, 1  ;;  %p512_p5 = scmp.ge.s32.totalorder %s822_s12, 1 }
   0x9   : > { %p876_p4 = por %p1129_p1, %p39_p0  ;;  %p97_p7 = scmp.lt.s32.totalorder %s822_s12, 3 }
   0xa   : > { %p881_p6 = por %p90_p3, %p39_p0  ;;  %s824_s18 = smov [#allocation5]  }
   0xb   : > { %s1132_s15 = scalar_select %p876_p4, 1, 0 }
   0xc   : > { %s1133_s16 = scalar_select %p881_p6, 1, 0 }
   0xd   : > { %p886_p8 = pnand %p512_p5, %p97_p7  ;;  %s109_s19 = sshll.u32 %s824_s18, 4  ;;  %s890_s19 = int_to_ptr.vmem [resolvable:$true] %s109_s19 }
   0xe   : > { %s902_s21 = sadd.s32 1, %s822_s12   ;;  %s26_s22 = sadd.s32 1, %s818_s11 }
   0xf   : > { %s1134_s17 = scalar_select %p886_p8, 1, 0 }
  0x10   : > { %p641_p9 = pneg %p886_p8  ;;  %s23_s23 = ssub.s32 %s822_s12, %s902_s21 }
  0x11   : > { %s694_s26 = scalar_lea.hbm %s1127_s1, 1024 }
  0x12   : > { %p897_p11 = pnand %p641_p9, %p1129_p1  ;;  %p695_p12 = scmp.ne.s32.totalorder %s1127_s1, %s694_s26 }
  0x13   : > { %p701_p5 = scmp.lt.u32.totalorder %s694_s26, %s1127_s1 }
  0x14   : > { %p696_p13 = pneg %p897_p11 }
  0x16   : > { %p697_p0 = pnand %p696_p13, %p695_p12 }
  0x18   : > { %p698_p3 = pneg %p697_p0 }
  0x1a   : > { %p703_p7 = pnand %p701_p5, %p698_p3 }
  0x1c   : > { %706 = shalt.err (!%p703_p7)
}
  0x1d   : > { %s707_s3 = scalar_lea.vmem %s890_s19, 1024  ;;  %p715_p2 = scmp.lt.s32.totalorder %s890_s19, %s890_s19 }
  0x1e   : > { %p708_p9 = scmp.ne.s32.totalorder %s890_s19, %s707_s3  ;;  %p716_p6 = scmp.lt.s32.totalorder %s707_s3, %s707_s3 }
  0x20   : > { %p710_p10 = pnand %p708_p9, %p696_p13  ;;  %p717_p4 = por %p716_p6, %p715_p2 }
  0x22   : > { %p711_p1 = pneg %p710_p10 }
  0x24   : > { %p718_p8 = pnand %p717_p4, %p711_p1 }
  0x26   : > { %721 = shalt.err (!%p718_p8)
}
  0x27   : > { %s825_s4 = smov 128   ;;  %s826_s5 = smov 8  }
  0x28   : > { %644 = dma.hbm_to_vmem [thread:$0]  (!%p897_p11), %s1127_s1, 1024, %s890_s19, [#allocation6], %s825_s4, %s825_s4, %s826_s5  }
  0x29   : > { %p24_p1 = scmp.eq.s32.totalorder %s23_s23, 0  ;;  %p33_p2 = scmp.ne.s32.totalorder %s818_s11, %s814_s10 }
  0x2a   : > { %p34_p4 = scmp.eq.s32.totalorder %s822_s12, 0  ;;  %p654_p6 = scmp.lt.s32.totalorder %s822_s12, 2 }
  0x2b   : > { %s936_s8 = scalar_select %p24_p1, %s818_s11, %s26_s22  }
  0x2c   : > { %p35_p8 = por %p34_p4, %p33_p2  ;;  %p1136_p10 = scmp.eq.s32.totalorder %s867_s13, 1 }
  0x2d   : > { %s123_s18 = sand.u32 1, %s818_s11   ;;  %s543_s20 = sshll.u32 %s822_s12, 11 }
  0x2e   : > { %p940_p12 = por %p1136_p10, %p33_p2  ;;  %s515_s24 = sshll.u32 %s123_s18, 7 }
  0x2f   : > { %s949_s27 = scalar_lea.hbm %s1126_s0, %s543_s20  ;;  %s127_s19 = scalar_lea.vmem [#allocation2], %s515_s24 }
  0x30   : > { %s134_s22 = sshll.u32 %s127_s19, 4  ;;  %p951_p11 = pnand %p654_p6, %p35_p8  ;;  %s955_s22 = int_to_ptr.vmem [resolvable:$true] %s134_s22 }
  0x31   : > { %s957_s28 = scalar_lea.sflag [#allocation3], %s123_s18  ;;  %s722_s29 = scalar_lea.hbm %s949_s27, 2048 }
  0x32   : > { %p723_p13 = scmp.ne.s32.totalorder %s949_s27, %s722_s29  ;;  %p724_p0 = pneg %p951_p11 }
  0x33   : > { %s727_s6 = scalar_lea.hbm %s1126_s0, 4096  ;;  %p728_p7 = scmp.lt.u32.totalorder %s949_s27, %s1126_s0 }
  0x34   : > { %p725_p3 = pnand %p724_p0, %p723_p13  ;;  %p729_p9 = scmp.lt.u32.totalorder %s727_s6, %s722_s29 }
  0x35   : > { %p731_p2 = scmp.lt.u32.totalorder %s722_s29, %s949_s27 }
  0x36   : > { %p726_p5 = pneg %p725_p3  ;;  %p730_p1 = por %p729_p9, %p728_p7 }
  0x38   : > { %p732_p4 = por %p731_p2, %p730_p1 }
  0x3a   : > { %p733_p6 = pnand %p732_p4, %p726_p5 }
  0x3c   : > { %736 = shalt.err (!%p733_p6)
}
  0x3d   : > { %s737_s18 = scalar_lea.vmem %s955_s22, 2048  ;;  %s827_s24 = smov [#allocation2]  }
  0x3e   : > { %p738_p8 = scmp.ne.s32.totalorder %s955_s22, %s737_s18  ;;  %s742_s25 = sshll.u32 %s827_s24, 4  ;;  %s743_s25 = int_to_ptr.vmem [resolvable:$false] %s742_s25 }
  0x3f   : > { %s744_s26 = scalar_lea.vmem %s743_s25, 4096  ;;  %p745_p3 = scmp.lt.s32.totalorder %s955_s22, %s743_s25 }
  0x40   : > { %p740_p10 = pnand %p738_p8, %p724_p0  ;;  %p746_p7 = scmp.lt.s32.totalorder %s744_s26, %s737_s18 }
  0x42   : > { %p741_p13 = pneg %p740_p10  ;;  %p747_p9 = por %p746_p7, %p745_p3 }
  0x44   : > { %p748_p1 = pnand %p747_p9, %p741_p13 }
  0x46   : > { %751 = shalt.err (!%p748_p1)
}
  0x47   : > { %648 = dma.hbm_to_vmem [thread:$0]  (!%p951_p11), %s949_s27, 2048, %s955_s22, %s957_s28, %s825_s4, %s825_s4, %s826_s5  }
  0x48   : > { %p1139_p0 = scmp.ne.s32.totalorder %s1134_s17, 0 }
  0x49   : > { %s991_s19 = sand.u32 (!%p1139_p0), 1, %s814_s10   ;;  %p1140_p5 = scmp.ne.s32.totalorder (!%p1139_p0), %s1132_s15, 0 }
  0x4a   : > { %146 = sbr.rel (%p1139_p0) target bundleno = 344 (0x158), region = 28  ;;  %s519_s29 = sshll.u32 (!%p1139_p0), %s991_s19, 7 }
  0x4b   : > { %s149_s30 = scalar_lea.sflag (!%p1139_p0), [#allocation3], %s991_s19  ;;  %s997_s23 = scalar_lea.vmem (!%p1139_p0), [#allocation2], %s519_s29 }
  0x51   : > { %797 = dma.done.wait (%p1140_p5), %s149_s30, 2048  }
  0x52   : > { %799 = vsyncadd (%p1140_p5), %s149_s30, 4294965248  ;;  %p1141_p11 = scmp.eq.s32.totalorder %s867_s13, 0 }
  0x54   : > { %801 = dma.done.wait (%p1141_p11), [#allocation6], 1024   ;;  %p1142_p2 = pmov %p1141_p11 }
  0x55   : > { %v195_v0 = vld [vmem:[#allocation5] sm:$0xff]  ;;  %v196_v1 = vld [vmem:[#allocation5 + $0x8] sm:$0xff]  ;;  %v197_v2 = vld [vmem:[#allocation5 + $0x10] sm:$0xff]  ;;  %vm203_vm0 = vcmask 523264   ;;  %vm397_vm1 = vcmask 261120   ;;  %s1041_s15 = scalar_lea.vmem [#allocation7], %s519_s29 }
  0x56   : > { %803 = vsyncadd (%p1142_p2), [#allocation6], 4294966272  ;;  %v609_v3 = vpack.c.bf16 %v196_v1, %v195_v0  ;;  %v198_v4 = vld [vmem:[#allocation5 + $0x18] sm:$0xff]  ;;  %v199_v6 = vld [vmem:[#allocation5 + $0x20] sm:$0xff]  ;;  %s544_s17 = sshll.u32 %s867_s13, 11  ;;  %s428_s4 = sshll.u32 %s1041_s15, 4  ;;  %s1074_s4 = int_to_ptr.vmem [resolvable:$true] %s428_s4 }
  0x57   : > { %v613_v5 = vpack.c.bf16 %v198_v4, %v197_v2  ;;  %v200_v7 = vld [vmem:[#allocation5 + $0x28] sm:$0xff]  ;;  %v179_v8 = vld [vmem:[%s997_s23] sm:$0xff]  ;;  %v201_v11 = vld [vmem:[#allocation5 + $0x30] sm:$0xff]  ;;  %s1072_s22 = scalar_lea.hbm %s1128_s2, %s544_s17  ;;  %s415_s13 = scalar_lea.sflag [#allocation4], %s991_s19 }
  0x58   : > { %610 = vmatprep.subr.bf16.mxu0 %v609_v3  ;;  %625 = vmatprep.subr.bf16.mxu1 %v609_v3  ;;  %v187_v9 = vld [vmem:[%s997_s23 + $0x40] sm:$0xff]  ;;  %v617_v10 = vpack.c.bf16 %v200_v7, %v199_v6  ;;  %v202_v12 = vld [vmem:[#allocation5 + $0x38] sm:$0xff]  ;;  %v180_v14 = vld [vmem:[%s997_s23 + $0x8] sm:$0xff]  ;;  %s752_s28 = scalar_lea.vmem %s1074_s4, 2048  ;;  %s828_s3 = smov [#allocation7]  }
  0x59   : > { %612 = vmatpush3.bf16.msra.mxu0 %v609_v3  ;;  %629 = vmatpush3.bf16.msra.mxu1 %v609_v3  ;;  %v621_v13 = vpack.c.bf16 %v202_v12, %v201_v11  ;;  %v188_v15 = vld [vmem:[%s997_s23 + $0x48] sm:$0xff]  ;;  %v181_v16 = vld [vmem:[%s997_s23 + $0x10] sm:$0xff]  ;;  %v182_v18 = vld [vmem:[%s997_s23 + $0x18] sm:$0xff]  ;;  %p753_p4 = scmp.ne.s32.totalorder %s1074_s4, %s752_s28  ;;  %s756_s6 = sshll.u32 %s828_s3, 4  ;;  %s757_s6 = int_to_ptr.vmem [resolvable:$false] %s756_s6 }
  0x5a   : > { %614 = vmatprep.subr.bf16.mxu0 %v613_v5  ;;  %626 = vmatprep.subr.bf16.mxu1 %v613_v5  ;;  %v189_v17 = vld [vmem:[%s997_s23 + $0x50] sm:$0xff]  ;;  %v190_v19 = vld [vmem:[%s997_s23 + $0x58] sm:$0xff]  ;;  %v183_v20 = vld [vmem:[%s997_s23 + $0x20] sm:$0xff]  ;;  %s758_s7 = scalar_lea.vmem %s757_s6, 4096  ;;  %p759_p10 = scmp.lt.s32.totalorder %s1074_s4, %s757_s6 }
  0x5b   : > { %585 = vmatprep.mubr.msk.f32.mxu0 %vm203_vm0, %v179_v8  ;;  %597 = vmatprep.mubr.msk.f32.mxu1 %vm203_vm0, %v187_v9  ;;  %v191_v21 = vld [vmem:[%s997_s23 + $0x60] sm:$0xff]  ;;  %v184_v22 = vld [vmem:[%s997_s23 + $0x28] sm:$0xff]  ;;  %v185_v24 = vld [vmem:[%s997_s23 + $0x30] sm:$0xff]  ;;  %p754_p6 = pnand %p753_p4, %p940_p12  ;;  %p760_p13 = scmp.lt.s32.totalorder %s758_s7, %s752_s28 }
  0x5c   : > { %v192_v23 = vld [vmem:[%s997_s23 + $0x68] sm:$0xff]  ;;  %v193_v25 = vld [vmem:[%s997_s23 + $0x70] sm:$0xff]  ;;  %v186_v26 = vld [vmem:[%s997_s23 + $0x38] sm:$0xff] }
  0x5d   : > { %616 = vmatpush3.bf16.msra.mxu0 %v613_v5  ;;  %630 = vmatpush3.bf16.msra.mxu1 %v613_v5  ;;  %v194_v27 = vld [vmem:[%s997_s23 + $0x78] sm:$0xff]  ;;  %p755_p8 = pneg %p754_p6  ;;  %p761_p3 = por %p760_p13, %p759_p10 }
  0x5e   : > { %618 = vmatprep.subr.bf16.mxu0 %v617_v10  ;;  %627 = vmatprep.subr.bf16.mxu1 %v617_v10 }
  0x5f   : > { %p762_p7 = pnand %p761_p3, %p755_p8 }
  0x61   : > { %620 = vmatpush3.bf16.msra.mxu0 %v617_v10  ;;  %631 = vmatpush3.bf16.msra.mxu1 %v617_v10 }
  0x62   : > { %622 = vmatprep.subr.bf16.mxu0 %v621_v13  ;;  %628 = vmatprep.subr.bf16.mxu1 %v621_v13 }
  0x65   : > { %624 = vmatpush3.bf16.msra.mxu0 %v621_v13  ;;  %632 = vmatpush3.bf16.msra.mxu1 %v621_v13 }
  0x68   : > { %586 = vmatmul.mubr.msk.f32.vlgmr.msra.gmra.mrb[0].mxu0 %vm203_vm0, %v180_v14  ;;  %598 = vmatmul.mubr.msk.f32.vlgmr.msra.gmra.mrb[0].mxu1 %vm203_vm0, %v188_v15 }
  0x69   : > { %588 = vmatprep.mubr.msk.f32.mxu0 %vm203_vm0, %v181_v16  ;;  %600 = vmatprep.mubr.msk.f32.mxu1 %vm203_vm0, %v189_v17 }
  0x6c   : > { %589 = vmatmul.mubr.msk.f32.gmra.mrb[2].mxu0 %vm203_vm0, %v182_v18  ;;  %601 = vmatmul.mubr.msk.f32.gmra.mrb[2].mxu1 %vm203_vm0, %v190_v19 }
  0x6d   : > { %591 = vmatprep.mubr.msk.f32.mxu0 %vm203_vm0, %v183_v20  ;;  %603 = vmatprep.mubr.msk.f32.mxu1 %vm203_vm0, %v191_v21 }
  0x70   : > { %592 = vmatmul.mubr.msk.f32.gmra.mrb[4].mxu0 %vm203_vm0, %v184_v22  ;;  %604 = vmatmul.mubr.msk.f32.gmra.mrb[4].mxu1 %vm203_vm0, %v192_v23 }
  0x71   : > { %594 = vmatprep.mubr.msk.f32.mxu0 %vm203_vm0, %v185_v24  ;;  %606 = vmatprep.mubr.msk.f32.mxu1 %vm203_vm0, %v193_v25 }
  0x74   : > { %595 = vmatmul.mubr.msk.f32.gmra.mrb[6].mxu0 %vm203_vm0, %v186_v26  ;;  %607 = vmatmul.mubr.msk.f32.gmra.mrb[6].mxu1 %vm203_vm0, %v194_v27 }
 0x13b   : > { %v587_v28 = vpop.f32.mrb[0].mxu0  ;;  %v599_v29 = vpop.f32.mrb[0].mxu1 }
 0x13c   : > { %399 = vst.msk [vmem:[%s1041_s15 + $0x8] sm:$0xff] %vm397_vm1, %v587_v28  ;;  %407 = vst.msk [vmem:[%s1041_s15 + $0x48] sm:$0xff] %vm397_vm1, %v599_v29  ;;  %v318_v30 = vpop.f32.mrb[1].mxu0  ;;  %v358_v31 = vpop.f32.mrb[1].mxu1 }
 0x13d   : > { %398 = vst.msk [vmem:[%s1041_s15] sm:$0xff] %vm397_vm1, %v318_v30  ;;  %406 = vst.msk [vmem:[%s1041_s15 + $0x40] sm:$0xff] %vm397_vm1, %v358_v31 }
 0x13f   : > { %v590_v32 = vpop.f32.mrb[2].mxu0  ;;  %v602_v33 = vpop.f32.mrb[2].mxu1 }
 0x140   : > { %401 = vst.msk [vmem:[%s1041_s15 + $0x18] sm:$0xff] %vm397_vm1, %v590_v32  ;;  %409 = vst.msk [vmem:[%s1041_s15 + $0x58] sm:$0xff] %vm397_vm1, %v602_v33  ;;  %v328_v34 = vpop.f32.mrb[3].mxu0  ;;  %v368_v35 = vpop.f32.mrb[3].mxu1 }
 0x141   : > { %400 = vst.msk [vmem:[%s1041_s15 + $0x10] sm:$0xff] %vm397_vm1, %v328_v34  ;;  %408 = vst.msk [vmem:[%s1041_s15 + $0x50] sm:$0xff] %vm397_vm1, %v368_v35 }
 0x143   : > { %v593_v36 = vpop.f32.mrb[4].mxu0  ;;  %v605_v37 = vpop.f32.mrb[4].mxu1 }
 0x144   : > { %403 = vst.msk [vmem:[%s1041_s15 + $0x28] sm:$0xff] %vm397_vm1, %v593_v36  ;;  %411 = vst.msk [vmem:[%s1041_s15 + $0x68] sm:$0xff] %vm397_vm1, %v605_v37  ;;  %v338_v38 = vpop.f32.mrb[5].mxu0  ;;  %v378_v39 = vpop.f32.mrb[5].mxu1 }
 0x145   : > { %402 = vst.msk [vmem:[%s1041_s15 + $0x20] sm:$0xff] %vm397_vm1, %v338_v38  ;;  %410 = vst.msk [vmem:[%s1041_s15 + $0x60] sm:$0xff] %vm397_vm1, %v378_v39 }
 0x147   : > { %v596_v40 = vpop.f32.mrb[6].mxu0  ;;  %v608_v41 = vpop.f32.mrb[6].mxu1 }
 0x148   : > { %405 = vst.msk [vmem:[%s1041_s15 + $0x38] sm:$0xff] %vm397_vm1, %v596_v40  ;;  %413 = vst.msk [vmem:[%s1041_s15 + $0x78] sm:$0xff] %vm397_vm1, %v608_v41  ;;  %v348_v42 = vpop.f32.mrb[7].mxu0  ;;  %v388_v43 = vpop.f32.mrb[7].mxu1 }
 0x149   : > { %404 = vst.msk [vmem:[%s1041_s15 + $0x30] sm:$0xff] %vm397_vm1, %v348_v42  ;;  %412 = vst.msk [vmem:[%s1041_s15 + $0x70] sm:$0xff] %vm397_vm1, %v388_v43 }
 0x14a   : > { %765 = shalt.err (!%p762_p7)
}
 0x14b   : > { %s766_s20 = scalar_lea.hbm %s1072_s22, 2048  ;;  %s770_s25 = scalar_lea.hbm %s1128_s2, 4096 }
 0x14c   : > { %p767_p9 = scmp.ne.s32.totalorder %s1072_s22, %s766_s20  ;;  %p771_p5 = scmp.lt.u32.totalorder %s1072_s22, %s1128_s2 }
 0x14d   : > { %p772_p11 = scmp.lt.u32.totalorder %s770_s25, %s766_s20  ;;  %p774_p4 = scmp.lt.u32.totalorder %s766_s20, %s1072_s22 }
 0x14e   : > { %p768_p1 = pnand %p767_p9, %p940_p12 }
 0x14f   : > { %p773_p2 = por %p772_p11, %p771_p5 }
 0x150   : > { %p769_p0 = pneg %p768_p1 }
 0x151   : > { %p775_p6 = por %p774_p4, %p773_p2 }
 0x153   : > { %p776_p8 = pnand %p775_p6, %p769_p0 }
 0x155   : > { %779 = shalt.err (!%p776_p8)
}
 0x156   : > { %s829_s30 = smov 128   ;;  %s830_s23 = smov 8  }
 0x157   : > { %639 = dma.vmem_to_hbm [thread:$0]  (%p940_p12), %s1074_s4, 2048, %s1072_s22, %s415_s13, %s829_s30, %s829_s30, %s830_s23  }
 0x158 PF: > { %s443_s15 = sand.u32 1, %s810_s9   ;;  %p1143_p10 = scmp.ne.s32.totalorder %s1133_s16, 0 }
 0x159   : > { %p1144_p13 = scmp.ge.s32.totalorder %s822_s12, 2  ;;  %s444_s17 = scalar_lea.sflag [#allocation4], %s443_s15 }
 0x15b   : > { %p650_p3 = pnand %p1144_p13, %p1143_p10 }
 0x15d   : > { %805 = dma.done.wait (!%p650_p3), %s444_s17, 2048  }
 0x15e   : > { %807 = vsyncadd (!%p650_p3), %s444_s17, 4294965248  ;;  %p16_p7 = scmp.ge.s32.totalorder %s902_s21, 4   ;;  %s1145_s9 = smov %s814_s10 }
 0x15f   : > { %s1146_s10 = smov %s818_s11  ;;  %s1147_s11 = smov %s936_s8 }
 0x160   : > { %s1148_s12 = smov %s902_s21  ;;  %18 = sbr.rel (!%p16_p7) target bundleno = 6 (0x6), region = 77 }
 0x167   :  { %449 = vsyncpa [#allocation3], 1 }
 0x168   :  { %451 = vsyncpa [#allocation3 + $0x1], 1 }
 0x169   :  { %452 = vsyncpa [#allocation6], 1 }
 0x16a   :  { %453 = vsyncpa [#allocation4], 1 }
 0x16b   :  { %455 = vsyncpa [#allocation4 + $0x1], 1 }

</bundles_post_ra>
